<compile_context>
chip_gen: v5e
topology: v5e:2x2
jax: 0.10.0
libtpu: 0.0.40
codegen_flags: <defaults>
</compile_context>

<pallas_src>
import functools
import math

import jax
import jax.numpy as jnp
from jax import lax
from jax.experimental import pallas as pl
from jax.experimental.pallas import tpu as pltpu

BN_EPS = 1e-5  # PyTorch BatchNorm1d default


# --------------------------------------------------------------------------- #
# Host-side sizing helpers
# --------------------------------------------------------------------------- #
def _vmem_capacity_bytes():
    """Per-core VMEM capacity; conservative 64 MiB fallback (v7x size)."""
    try:
        info = pltpu.get_tpu_info()
        for name in ("vmem_capacity_bytes", "vmem_size_bytes", "vmem_bytes"):
            cap = getattr(info, name, None)
            if cap:
                return int(cap)
    except Exception:
        pass
    return 64 * 2**20


def _pick_samples_per_tile(n, c, l, target_bytes):
    """Whole samples per lane tile, sized by bytes.

    Prefers tiles whose lane width is a multiple of 128 (pltpu.roll + unmasked
    stores); if no 128-aligned whole-sample tiling divides N, fall back to a single
    full-axis tile (block == full array dims, so no (8,128) constraint violation).
    """
    per_sample = max(c * l * 4, 1)
    divisors = [s for s in range(1, n + 1) if n % s == 0]
    aligned = [s for s in divisors if (s * l) % 128 == 0]
    if aligned:
        fits = [s for s in aligned if s * per_sample <= target_bytes]
        return max(fits) if fits else min(aligned)
    # TODO(synk): for very large, non-128-aligned N*L, pad L to a 128 multiple
    # instead of using one full-axis tile.
    return n


def _bn_affine(sum_c1, sq_c1, gamma, beta, count):
    """Fold training-mode BatchNorm1d into per-channel (scale, shift): (2, C, 1)."""
    mean = sum_c1 / count
    var = sq_c1 / count - mean * mean
    scale = gamma.reshape(-1, 1) * lax.rsqrt(var + BN_EPS)
    shift = beta.reshape(-1, 1) - mean * scale
    return jnp.stack([scale, shift]).astype(jnp.float32)  # (2, C, 1)


# --------------------------------------------------------------------------- #
# Kernel-side helpers
# --------------------------------------------------------------------------- #
def _conv3_fused(h, wf, prev_mask, next_mask, tile_nl):
    """'same' 3-tap conv (stride 1, no bias) as one (C,3C)@(3C,T) MXU matmul.

    Tiles contain whole samples, so the per-sample zero padding is the precomputed
    (1, T) boundary masks applied while building the stacked operand — no halo.
    """
    if tile_nl % 128 == 0:
        h_prev = pltpu.roll(h, shift=1, axis=1) * prev_mask            # h[:, j-1]
        h_next = pltpu.roll(h, shift=tile_nl - 1, axis=1) * next_mask  # h[:, j+1]
    else:
        zero = jnp.zeros((h.shape[0], 1), h.dtype)
        h_prev = jnp.concatenate([zero, h[:, : tile_nl - 1]], axis=1) * prev_mask
        h_next = jnp.concatenate([h[:, 1:], zero], axis=1) * next_mask
    stacked = jnp.concatenate([h_prev, h, h_next], axis=0)             # (3C, T)
    return jnp.dot(wf, stacked, preferred_element_type=jnp.float32)


def _stats1_kernel(x_ref, w1_ref, mask_ref, sum_ref, sq_ref, *, tile_nl):
    pm, nm = mask_ref[0:1, :], mask_ref[1:2, :]
    h1 = _conv3_fused(x_ref[...], w1_ref[...], pm, nm, tile_nl)
    sum_ref[0] = jnp.sum(h1, axis=1, keepdims=True)
    sq_ref[0] = jnp.sum(h1 * h1, axis=1, keepdims=True)


def _stats2_kernel(x_ref, w1_ref, w2_ref, mask_ref, bn1_ref,
                   sum_ref, sq_ref, *, tile_nl):
    pm, nm = mask_ref[0:1, :], mask_ref[1:2, :]
    h1 = _conv3_fused(x_ref[...], w1_ref[...], pm, nm, tile_nl)
    a = jnp.maximum(h1 * bn1_ref[0] + bn1_ref[1], 0.0)
    h2 = _conv3_fused(a, w2_ref[...], pm, nm, tile_nl)
    sum_ref[0] = jnp.sum(h2, axis=1, keepdims=True)
    sq_ref[0] = jnp.sum(h2 * h2, axis=1, keepdims=True)


def _stats2_stash_kernel(x_ref, w1_ref, w2_ref, mask_ref, bn1_ref,
                         sum_ref, sq_ref, a_ref, *, tile_nl):
    pm, nm = mask_ref[0:1, :], mask_ref[1:2, :]
    h1 = _conv3_fused(x_ref[...], w1_ref[...], pm, nm, tile_nl)
    a = jnp.maximum(h1 * bn1_ref[0] + bn1_ref[1], 0.0)
    h2 = _conv3_fused(a, w2_ref[...], pm, nm, tile_nl)
    sum_ref[0] = jnp.sum(h2, axis=1, keepdims=True)
    sq_ref[0] = jnp.sum(h2 * h2, axis=1, keepdims=True)
    a_ref[...] = a.astype(a_ref.dtype)          # stash post-ReLU activation to HBM


def _apply_kernel(x_ref, w1_ref, w2_ref, mask_ref, bn1_ref, bn2_ref, o_ref,
                  *, tile_nl):
    pm, nm = mask_ref[0:1, :], mask_ref[1:2, :]
    x = x_ref[...]
    h1 = _conv3_fused(x, w1_ref[...], pm, nm, tile_nl)
    a = jnp.maximum(h1 * bn1_ref[0] + bn1_ref[1], 0.0)
    h2 = _conv3_fused(a, w2_ref[...], pm, nm, tile_nl)
    o_ref[...] = x + h2 * bn2_ref[0] + bn2_ref[1]


def _apply_stash_kernel(x_ref, a_ref, w2_ref, mask_ref, bn2_ref, o_ref, *, tile_nl):
    pm, nm = mask_ref[0:1, :], mask_ref[1:2, :]
    h2 = _conv3_fused(a_ref[...], w2_ref[...], pm, nm, tile_nl)
    o_ref[...] = x_ref[...] + h2 * bn2_ref[0] + bn2_ref[1]


# --------------------------------------------------------------------------- #
# Wrapper
# --------------------------------------------------------------------------- #
def residual_block(x, w1, w2, g1, b1, g2, b2, *,
                   stash_activation=None, target_tile_bytes=None):
    """x: (N, C, L) f32. w1, w2: PyTorch Conv1d layout (C_out, C_in, 3)."""
    n, c, l = x.shape
    nl = n * l
    # Channels on sublanes, flattened (batch, length) on lanes.
    x2d = jnp.transpose(x, (1, 0, 2)).reshape(c, nl)
    # Fuse taps along K: w_fused[co, k*C + ci] = w[co, ci, k]  ->  (C, 3C).
    w1f = jnp.transpose(w1, (0, 2, 1)).reshape(c, 3 * c)
    w2f = jnp.transpose(w2, (0, 2, 1)).reshape(c, 3 * c)

    vmem_cap = _vmem_capacity_bytes()
    if target_tile_bytes is None:
        # ~1-4 MiB tiles (HBM-roofline sweet spot), shrunk on small-VMEM chips.
        target_tile_bytes = min(4 * 2**20, vmem_cap // 20)
    s = _pick_samples_per_tile(n, c, l, target_tile_bytes)
    tile_nl = s * l
    num_tiles = nl // tile_nl

    if stash_activation is None:
        # Recompute conv1 in pass 3 when HBM-bound (small C); stash the post-ReLU
        # activation instead once the kernel is MXU-bound (large C).
        stash_activation = c >= 64

    # Per-sample boundary masks, tiled to one lane tile (same for every tile).
    lpos = jnp.arange(l, dtype=jnp.int32)
    masks = jnp.stack([jnp.tile((lpos != 0).astype(x.dtype), s),
                       jnp.tile((lpos != l - 1).astype(x.dtype), s)])  # (2, tile_nl)

    # Explicit VMEM budget: ~16 live/pipelined (C, T) f32 slabs + weights + masks.
    slab = c * tile_nl * 4
    est = 16 * slab + 2 * (c * 3 * c * 4) + 4 * (2 * tile_nl * 4) + (4 << 20)
    vmem_limit = int(min(max(est, 32 * 2**20), max(int(0.85 * vmem_cap), 32 * 2**20)))
    cparams = pltpu.CompilerParams(dimension_semantics=("parallel",),
                                   vmem_limit_bytes=vmem_limit)

    data_spec = pl.BlockSpec((c, tile_nl), lambda t: (0, t))
    w_spec = pl.BlockSpec((c, 3 * c), lambda t: (0, 0))          # VMEM-resident
    mask_spec = pl.BlockSpec((2, tile_nl), lambda t: (0, 0))     # VMEM-resident
    stat_spec = pl.BlockSpec((1, c, 1), lambda t: (t, 0, 0))     # per-tile partials
    bn_spec = pl.BlockSpec((2, c, 1), lambda t: (0, 0, 0))
    stat_shape = jax.ShapeDtypeStruct((num_tiles, c, 1), jnp.float32)

    # ---- pass 1: conv1 -> per-tile BN1 partial sum / sumsq -------------------
    psum1, psq1 = pl.pallas_call(
        functools.partial(_stats1_kernel, tile_nl=tile_nl),
        out_shape=(stat_shape, stat_shape),
        grid_spec=pltpu.PrefetchScalarGridSpec(
            num_scalar_prefetch=0, grid=(num_tiles,),
            in_specs=[data_spec, w_spec, mask_spec],
            out_specs=(stat_spec, stat_spec)),
        compiler_params=cparams,
    )(x2d, w1f, masks)
    bn1 = _bn_affine(jnp.sum(psum1, axis=0), jnp.sum(psq1, axis=0), g1, b1, nl)

    # ---- pass 2: conv1+BN1+ReLU, conv2 -> per-tile BN2 partial stats ----------
    if stash_activation:
        out_shape2 = (stat_shape, stat_shape, jax.ShapeDtypeStruct((c, nl), x.dtype))
        out_specs2 = (stat_spec, stat_spec, data_spec)
        kern2 = _stats2_stash_kernel
    else:
        out_shape2 = (stat_shape, stat_shape)
        out_specs2 = (stat_spec, stat_spec)
        kern2 = _stats2_kernel
    res2 = pl.pallas_call(
        functools.partial(kern2, tile_nl=tile_nl),
        out_shape=out_shape2,
        grid_spec=pltpu.PrefetchScalarGridSpec(
            num_scalar_prefetch=0, grid=(num_tiles,),
            in_specs=[data_spec, w_spec, w_spec, mask_spec, bn_spec],
            out_specs=out_specs2),
        compiler_params=cparams,
    )(x2d, w1f, w2f, masks, bn1)
    psum2, psq2 = res2[0], res2[1]
    bn2 = _bn_affine(jnp.sum(psum2, axis=0), jnp.sum(psq2, axis=0), g2, b2, nl)

    # ---- pass 3: apply BN2 + residual, write lane-dense output ---------------
    if stash_activation:
        a2d = res2[2]
        out2d = pl.pallas_call(
            functools.partial(_apply_stash_kernel, tile_nl=tile_nl),
            out_shape=jax.ShapeDtypeStruct((c, nl), x.dtype),
            grid_spec=pltpu.PrefetchScalarGridSpec(
                num_scalar_prefetch=0, grid=(num_tiles,),
                in_specs=[data_spec, data_spec, w_spec, mask_spec, bn_spec],
                out_specs=data_spec),
            compiler_params=cparams,
        )(x2d, a2d, w2f, masks, bn2)
    else:
        out2d = pl.pallas_call(
            functools.partial(_apply_kernel, tile_nl=tile_nl),
            out_shape=jax.ShapeDtypeStruct((c, nl), x.dtype),
            grid_spec=pltpu.PrefetchScalarGridSpec(
                num_scalar_prefetch=0, grid=(num_tiles,),
                in_specs=[data_spec, w_spec, w_spec, mask_spec, bn_spec, bn_spec],
                out_specs=data_spec),
            compiler_params=cparams,
        )(x2d, w1f, w2f, masks, bn1, bn2)

    return jnp.transpose(out2d.reshape(c, n, l), (1, 0, 2))


# --------------------------------------------------------------------------- #
# Reference + test
# --------------------------------------------------------------------------- #
def reference(x, w1, w2, g1, b1, g2, b2):
    """Pure-JAX reference matching PyTorch ResidualBlock.forward (train-mode BN)."""
    def conv(h, w):
        return lax.conv_general_dilated(
            h, w, window_strides=(1,), padding=((1, 1),),
            dimension_numbers=('NCH', 'OIH', 'NCH'),
            precision=lax.Precision.HIGHEST)

    def bn(h, g, b):
        m = h.mean(axis=(0, 2), keepdims=True)
        v = ((h - m) ** 2).mean(axis=(0, 2), keepdims=True)
        return (h - m) / jnp.sqrt(v + BN_EPS) * g.reshape(1, -1, 1) + b.reshape(1, -1, 1)

    h = conv(x, w1)
    h = bn(h, g1, b1)
    h = jnp.maximum(h, 0.0)
    h = conv(h, w2)
    h = bn(h, g2, b2)
    return x + h


def _make_inputs(key, n, c, l):
    kx, k1, k2, kg1, kb1, kg2, kb2 = jax.random.split(key, 7)
    x = jax.random.normal(kx, (n, c, l), dtype=jnp.float32)
    w1 = 0.2 * jax.random.normal(k1, (c, c, 3), dtype=jnp.float32)
    w2 = 0.2 * jax.random.normal(k2, (c, c, 3), dtype=jnp.float32)
    g1 = 1.0 + 0.1 * jax.random.normal(kg1, (c,), dtype=jnp.float32)
    b1 = 0.1 * jax.random.normal(kb1, (c,), dtype=jnp.float32)
    g2 = 1.0 + 0.1 * jax.random.normal(kg2, (c,), dtype=jnp.float32)
    b2 = 0.1 * jax.random.normal(kb2, (c,), dtype=jnp.float32)
    return x, w1, w2, g1, b1, g2, b2


if __name__ == "__main__":
    # Case 1: module-sized shapes (N=2, C=4, L=16) -> single full-axis tile.
    args = _make_inputs(jax.random.PRNGKey(0), 2, 4, 16)
    out = jax.block_until_ready(residual_block(*args))
    ref = jax.block_until_ready(reference(*args))
    assert out.shape == args[0].shape and out.dtype == args[0].dtype
    assert jnp.allclose(out, ref, atol=1e-4, rtol=1e-4), \
        f"max abs err = {float(jnp.max(jnp.abs(out - ref)))}"

    # Case 2: multi-tile, 128-lane-aligned tiles (grid (2,), pltpu.roll path).
    args2 = _make_inputs(jax.random.PRNGKey(0), 16, 8, 16)
    out2 = jax.block_until_ready(residual_block(*args2, target_tile_bytes=4096))
    ref2 = jax.block_until_ready(reference(*args2))
    assert jnp.allclose(out2, ref2, atol=1e-4, rtol=1e-4), \
        f"max abs err (tiled) = {float(jnp.max(jnp.abs(out2 - ref2)))}"

    # Case 3: larger C exercises the activation-stash (no conv1 recompute) path.
    args3 = _make_inputs(jax.random.PRNGKey(1), 4, 64, 32)
    out3 = jax.block_until_ready(residual_block(*args3, stash_activation=True))
    ref3 = jax.block_until_ready(reference(*args3))
    assert jnp.allclose(out3, ref3, atol=5e-4, rtol=5e-4), \
        f"max abs err (stash) = {float(jnp.max(jnp.abs(out3 - ref3)))}"

    print("KERNEL_OK")
</pallas_src>

<mosaic_0001>
module attributes {stable_mosaic.version = 11 : i64} {
  func.func @_stats1_kernel(%arg0: i32, %arg1: memref<4x32xf32, #tpu.memory_space<vmem>>, %arg2: memref<4x12xf32, #tpu.memory_space<vmem>>, %arg3: memref<2x32xf32, #tpu.memory_space<vmem>>, %arg4: memref<1x4x1xf32, #tpu.memory_space<vmem>>, %arg5: memref<1x4x1xf32, #tpu.memory_space<vmem>>) attributes {dimension_semantics = [#tpu.dimension_semantics<parallel>], iteration_bounds = array<i64: 1>, scalar_prefetch = 0 : i64, scratch_operands = 0 : i64, tpu.core_type = #tpu.core_type<tc>, window_params = [{transform_indices = @transform_0, window_bounds = array<i64: 4, 32>}, {pipeline_mode = #tpu.pipeline_mode<synchronous>, transform_indices = @transform_1, window_bounds = array<i64: 4, 12>}, {pipeline_mode = #tpu.pipeline_mode<synchronous>, transform_indices = @transform_2, window_bounds = array<i64: 2, 32>}, {transform_indices = @transform_3, window_bounds = array<i64: 1, 4, 1>}, {transform_indices = @transform_4, window_bounds = array<i64: 1, 4, 1>}]} {
    %c0 = arith.constant 0 : index
    %c0_0 = arith.constant 0 : index
    %0 = vector.load %arg3[%c0, %c0_0] : memref<2x32xf32, #tpu.memory_space<vmem>>, vector<1x32xf32>
    %c1 = arith.constant 1 : index
    %c0_1 = arith.constant 0 : index
    %1 = vector.load %arg3[%c1, %c0_1] : memref<2x32xf32, #tpu.memory_space<vmem>>, vector<1x32xf32>
    %c0_2 = arith.constant 0 : index
    %c0_3 = arith.constant 0 : index
    %2 = vector.load %arg1[%c0_2, %c0_3] : memref<4x32xf32, #tpu.memory_space<vmem>>, vector<4x32xf32>
    %c0_4 = arith.constant 0 : index
    %c0_5 = arith.constant 0 : index
    %3 = vector.load %arg2[%c0_4, %c0_5] : memref<4x12xf32, #tpu.memory_space<vmem>>, vector<4x12xf32>
    %cst = arith.constant 0.000000e+00 : f32
    %4 = vector.broadcast %cst : f32 to vector<4x1xf32>
    %5 = vector.extract_strided_slice %2 {offsets = [0, 0], sizes = [4, 31], strides = [1, 1]} : vector<4x32xf32> to vector<4x31xf32>
    %6 = tpu.concatenate %4, %5 in 1 : vector<4x1xf32>, vector<4x31xf32> -> vector<4x32xf32>
    %7 = vector.broadcast %0 : vector<1x32xf32> to vector<4x32xf32>
    %8 = arith.mulf %6, %7 : vector<4x32xf32>
    %9 = vector.extract_strided_slice %2 {offsets = [0, 1], sizes = [4, 31], strides = [1, 1]} : vector<4x32xf32> to vector<4x31xf32>
    %10 = tpu.concatenate %9, %4 in 1 : vector<4x31xf32>, vector<4x1xf32> -> vector<4x32xf32>
    %11 = vector.broadcast %1 : vector<1x32xf32> to vector<4x32xf32>
    %12 = arith.mulf %10, %11 : vector<4x32xf32>
    %13 = tpu.concatenate %8, %2, %12 in 0 : vector<4x32xf32>, vector<4x32xf32>, vector<4x32xf32> -> vector<12x32xf32>
    %cst_6 = arith.constant dense<0.000000e+00> : vector<4x32xf32>
    %14 = tpu.matmul %3, %13, %cst_6 {dimension_numbers = #tpu.dot_dimension_numbers<[1], [0], [0], [1], [0, 0, 1, 1], [], []>} : vector<4x12xf32>, vector<12x32xf32>, vector<4x32xf32> -> vector<4x32xf32>
    %cst_7 = arith.constant dense<0.000000e+00> : vector<4xf32>
    %15 = vector.multi_reduction <add>, %14, %cst_7 [1] : vector<4x32xf32> to vector<4xf32>
    %16 = vector.shape_cast %15 : vector<4xf32> to vector<4x1xf32>
    %c0_8 = arith.constant 0 : index
    %c0_9 = arith.constant 0 : index
    %c0_10 = arith.constant 0 : index
    %17 = vector.load %arg4[%c0_8, %c0_9, %c0_10] : memref<1x4x1xf32, #tpu.memory_space<vmem>>, vector<1x4x1xf32>
    %18 = vector.shape_cast %17 : vector<1x4x1xf32> to vector<4x1xf32>
    %19 = vector.shape_cast %16 : vector<4x1xf32> to vector<1x4x1xf32>
    tpu.vector_store %arg4[%c0_8, %c0_9, %c0_10], %19 {strides = array<i32>} : memref<1x4x1xf32, #tpu.memory_space<vmem>>, vector<1x4x1xf32>,
    %20 = arith.mulf %14, %14 : vector<4x32xf32>
    %cst_11 = arith.constant dense<0.000000e+00> : vector<4xf32>
    %21 = vector.multi_reduction <add>, %20, %cst_11 [1] : vector<4x32xf32> to vector<4xf32>
    %22 = vector.shape_cast %21 : vector<4xf32> to vector<4x1xf32>
    %c0_12 = arith.constant 0 : index
    %c0_13 = arith.constant 0 : index
    %c0_14 = arith.constant 0 : index
    %23 = vector.load %arg5[%c0_12, %c0_13, %c0_14] : memref<1x4x1xf32, #tpu.memory_space<vmem>>, vector<1x4x1xf32>
    %24 = vector.shape_cast %23 : vector<1x4x1xf32> to vector<4x1xf32>
    %25 = vector.shape_cast %22 : vector<4x1xf32> to vector<1x4x1xf32>
    tpu.vector_store %arg5[%c0_12, %c0_13, %c0_14], %25 {strides = array<i32>} : memref<1x4x1xf32, #tpu.memory_space<vmem>>, vector<1x4x1xf32>,
    return
  }
  func.func @transform_0(%arg0: i32) -> (i32, i32) {
    %c0_i32 = arith.constant 0 : i32
    %c0_i32_0 = arith.constant 0 : i32
    return %c0_i32, %arg0 : i32, i32
  }
  func.func @transform_1(%arg0: i32) -> (i32, i32) {
    %c0_i32 = arith.constant 0 : i32
    %c0_i32_0 = arith.constant 0 : i32
    %c0_i32_1 = arith.constant 0 : i32
    return %c0_i32, %c0_i32_0 : i32, i32
  }
  func.func @transform_2(%arg0: i32) -> (i32, i32) {
    %c0_i32 = arith.constant 0 : i32
    %c0_i32_0 = arith.constant 0 : i32
    %c0_i32_1 = arith.constant 0 : i32
    return %c0_i32, %c0_i32_0 : i32, i32
  }
  func.func @transform_3(%arg0: i32) -> (i32, i32, i32) {
    %c0_i32 = arith.constant 0 : i32
    %c0_i32_0 = arith.constant 0 : i32
    %c0_i32_1 = arith.constant 0 : i32
    return %arg0, %c0_i32, %c0_i32_0 : i32, i32, i32
  }
  func.func @transform_4(%arg0: i32) -> (i32, i32, i32) {
    %c0_i32 = arith.constant 0 : i32
    %c0_i32_0 = arith.constant 0 : i32
    %c0_i32_1 = arith.constant 0 : i32
    return %arg0, %c0_i32, %c0_i32_0 : i32, i32, i32
  }
}

</mosaic_0001>

<bundles_post_ra>
// kernel: tpu_custom_call.1
= control target key start
LH: loop header
LB: loop body
LE: loop exit
PB: predicated region body
PF: predicated region fallthrough
CT: control target
= control target key end

     0   :  { %10 = vsyncpa [#allocation3], 0  ;;  %s258_s0 = inlined_call_operand.hbm [shape: f32[4,32], index: 0, kind: input, shape index: {}]   ;;  %s259_s1 = inlined_call_operand.hbm [shape: f32[4,12], index: 1, kind: input, shape index: {}]   ;;  %s260_s2 = inlined_call_operand.hbm [shape: f32[2,32], index: 2, kind: input, shape index: {}]   ;;  %s261_s3 = inlined_call_operand.vmem [shape: f32[1,4,1], index: 3, kind: output, shape index: {0}]   ;;  %s262_s4 = inlined_call_operand.vmem [shape: f32[1,4,1], index: 4, kind: output, shape index: {1}]  }
   0x1   :  { %11 = vsyncpa [#allocation5], 0  ;;  %s28_s17 = sshll.u32 %s259_s1, 4  ;;  %s213_s18 = smov [#allocation4]   ;;  %s29_s17 = int_to_ptr.hbm [resolvable:$true] %s28_s17 }
   0x2   :  { %s30_s19 = sshll.u32 %s213_s18, 4  ;;  %s17_s22 = sshll.u32 %s258_s0, 4  ;;  %s31_s19 = int_to_ptr.vmem [resolvable:$true] %s30_s19  ;;  %s18_s22 = int_to_ptr.hbm [resolvable:$true] %s17_s22 }
   0x3   :  { %33 = dma.hbm_to_vmem [thread:$0]  %s29_s17, 64, %s31_s19, [#allocation5]  }
   0x4   :  { %s214_s23 = smov [#allocation2]   ;;  %s39_s27 = sshll.u32 %s260_s2, 4  ;;  %s40_s27 = int_to_ptr.hbm [resolvable:$true] %s39_s27 }
   0x5   :  { %s19_s24 = sshll.u32 %s214_s23, 4  ;;  %s215_s1 = smov [#allocation6]   ;;  %s20_s24 = int_to_ptr.vmem [resolvable:$true] %s19_s24 }
   0x6   :  { %22 = dma.hbm_to_vmem [thread:$0]  %s18_s22, 64, %s20_s24, [#allocation3]  }
   0x7   :  { %s41_s28 = sshll.u32 %s215_s1, 4  ;;  %s42_s28 = int_to_ptr.vmem [resolvable:$true] %s41_s28 }
   0x8   :  { %44 = dma.hbm_to_vmem [thread:$0]  %s40_s27, 32, %s42_s28, [#allocation5]  }
   0x9   :  { %209 = dma.done.wait [#allocation3], 64  }
   0xa   :  { %210 = vsyncadd [#allocation3], 4294967232 }
   0xb   :  { %211 = dma.done.wait [#allocation5], 96  }
   0xc   :  { %212 = vsyncadd [#allocation5], 4294967200  ;;  %v59_v0 = vld [vmem:[#allocation2] sm:$0xf]  ;;  %s216_s0 = smov 127   ;;  %s217_s29 = smov 1  }
   0xd   :  { %69 = vrot.lane.b32.xlu0 %v59_v0, %s216_s0  ;;  %vm72_vm0 = vcmask 252928   ;;  %v135_v1 = vld [vmem:[#allocation6 + $0x1] ss:$0 sm:$0xff]  ;;  %vm78_vm1 = vcmask 1043456   ;;  %vm65_vm2 = vcmask 7168   ;;  %v76_v6 = vrot.slane %v59_v0, 4 }
   0xe   :  { %v136_v5 = vld [vmem:[#allocation6] ss:$0 sm:$0xff]  ;;  %v60_v10 = vld [vmem:[#allocation4] sm:$0xf]  ;;  %vm80_vm3 = vcmask 97280   ;;  %vm107_vm4 = vcmask 257024  }
   0xf   :  { %vm111_vm5 = vcmask 3072  }
  0x15   :  { %62 = vrot.lane.b32.xlu0 %v59_v0, %s217_s29 }
  0x7f   :  { %v70_v2 = vpop.permute.xlu0 %69 }
  0x80   :  { %v73_v3 = vsel %vm72_vm0, %v70_v2, 0.0 }
  0x81   :  { %v75_v4 = vmul.f32 %v135_v1, %v73_v3 }
  0x83   :  { %128 = vmatpush.msk.msra.mxu0 %vm78_vm1, %v75_v4 }
  0x87   :  { %v63_v7 = vpop.permute.xlu0 %62 }
  0x88   :  { %v66_v8 = vsel %vm65_vm2, 0.0, %v63_v7 }
  0x89   :  { %v68_v9 = vmul.f32 %v136_v5, %v66_v8 }
  0x8b   :  { %v79_v11 = vsel %vm78_vm1, %v68_v9, %v76_v6 }
  0x8c   :  { %102 = vmatpush.msra.mxu0 %v79_v11 }
  0x8d   :  { %129 = vmatmul.msk.f32.vlgmr.msra.gmra.mxu0 %vm80_vm3, %v60_v10 }
 0x10a   :  { %v104_v12 = vpop.f32.mrf.mxu0 }
 0x10b   :  { %v108_v13 = vsel %vm107_vm4, %v104_v12, 0.0  ;;  %v113_v14 = vmul.f32 %v104_v12, %v104_v12 }
 0x10c   :  { %109 = vadd.xlane.f32.xlu1 %v108_v13 }
 0x10d   :  { %v114_v15 = vsel %vm107_vm4, %v113_v14, 0.0 }
 0x114   :  { %115 = vadd.xlane.f32.xlu1 %v114_v15 }
 0x17f   :  { %v110_v16 = vpop.xlane.xlu1 %109 }
 0x180   :  { %112 = vst.msk [vmem:[%s261_s3] sm:$0xf] %vm111_vm5, %v110_v16 }
 0x187   :  { %v116_v17 = vpop.xlane.xlu1 %115 }
 0x188   :  { %117 = vst.msk [vmem:[%s262_s4] sm:$0xf] %vm111_vm5, %v116_v17 }
 0x189   :  { %126 = vsyncpa [#allocation3], 1 }
 0x18a   :  { %127 = vsyncpa [#allocation5], 1 }

</bundles_post_ra>
